<compile_context>
chip_gen: v5e
topology: v5e:2x2
jax: 0.10.0
libtpu: 0.0.40
codegen_flags: <defaults>
</compile_context>

<pallas_src>
import math

import jax
import jax.numpy as jnp
from jax import lax
from jax.experimental import pallas as pl
from jax.experimental.pallas import tpu as pltpu


def _pick_tq(HW, C, Kpad, budget_bytes=24 * 1024 * 1024):
    """Largest query tile (multiple of 8, divides HW, <= HW//2 when possible)
    whose working set fits a cross-generation-safe VMEM budget.
    512 cap is safe on v7x (64 MiB physical / 32 MiB scoped); on v6e one could
    allow 1024 with a raised vmem limit for slightly better store density."""
    cap = max(HW // 2, 8)
    for tq in (512, 256, 128, 64, 32, 16, 8):
        if tq > cap or HW % tq:
            continue
        need = (2 * tq * HW * 4          # double-buffered output block
                + HW * Kpad * 4          # resident feat scratch
                + 2 * HW * C * 4         # (conservatively) double-buffered x
                + 2 * Kpad * 4)          # folded weight/bias
        if need <= budget_bytes:
            return tq
    # Fallback: single tile (HW not a multiple of 8) or smallest tile.
    return HW if (HW % 8) else 8


def _make_kernel(tq):
    def kernel(x_ref, wt_ref, bias_ref, o_ref, feat_ref):
        # x_ref:    (1, HW, C)   one batch element, channels-last
        # wt_ref:   (C, Kpad)    conv1x1 weight with BN scale & K**-0.25 folded in
        # bias_ref: (1, Kpad)    folded bias (zero in padded columns)
        # o_ref:    (1, TQ, HW)  softmaxed similarity rows for this query tile
        # feat_ref: (HW, Kpad)   VMEM scratch, persists across q-steps of a batch
        q = pl.program_id(1)

        # Compute feat once per batch element; reused by all q-tiles.
        @pl.when(q == 0)
        def _():
            x = x_ref[0]                                               # (HW, C)
            f = jnp.dot(x, wt_ref[...], preferred_element_type=jnp.float32)
            feat_ref[...] = jnp.maximum(f + bias_ref[...], 0.0)        # (HW, Kpad)

        start = pl.multiple_of(q * tq, tq)
        q_tile = feat_ref[pl.ds(start, tq), :]                         # (TQ, Kpad)

        # sim = query_tile @ feat^T  (K**-0.5 already folded via K**-0.25 on feat).
        # Contract dim 1 of both operands: no explicit transpose of feat.
        sim = lax.dot_general(
            q_tile, feat_ref[...],
            dimension_numbers=(((1,), (1,)), ((), ())),
            preferred_element_type=jnp.float32)                        # (TQ, HW)

        # Row-wise softmax (dim=-1), f32 math; cast only on the store.
        m = jnp.max(sim, axis=-1, keepdims=True)
        e = jnp.exp(sim - m)
        denom = jnp.sum(e, axis=-1, keepdims=True)
        o_ref[0] = (e * pl.reciprocal(denom, approx=True)).astype(o_ref.dtype)

    return kernel


def pixel_attention_forward_att(x_nchw, conv_w, conv_b,
                                bn_gamma, bn_beta, bn_mean, bn_var,
                                bn_eps=1e-5, out_dtype=jnp.float32):
    """x_nchw: [B, C, H, W].  Returns sim_map [B, H*W, H*W] in `out_dtype`."""
    B, C, H, W = x_nchw.shape
    K = conv_w.shape[0]
    HW = H * W
    Kpad = ((K + 127) // 128) * 128

    # NCHW -> [B, HW, C]; cost is ~C/HW of the output traffic (negligible here),
    # and it lets the 1x1 conv be a clean (HW, C) x (C, Kpad) MXU matmul.
    x = jnp.transpose(x_nchw, (0, 2, 3, 1)).reshape(B, HW, C).astype(jnp.float32)

    # Fold eval-mode BN and K**-0.25 into the conv weight / bias:
    #   feat_s = K**-0.25 * ReLU(BN(Conv(x))) = ReLU(Conv_{w',b'}(x))
    # (valid since K**-0.25 > 0 commutes with ReLU); then feat_s @ feat_s^T
    # carries exactly the K**-0.5 scaling of the reference.
    inv_std = 1.0 / jnp.sqrt(bn_var.astype(jnp.float32) + bn_eps)
    scale = bn_gamma.astype(jnp.float32) * inv_std                     # (K,)
    k_quarter = jnp.float32(float(K) ** (-0.25))
    w2d = conv_w.reshape(K, C).astype(jnp.float32)                     # (K, C)
    wt = (w2d * (scale * k_quarter)[:, None]).T                        # (C, K)
    bias = (conv_b.astype(jnp.float32) * scale
            + bn_beta.astype(jnp.float32)
            - bn_mean.astype(jnp.float32) * scale) * k_quarter         # (K,)

    # Zero-pad K to a lane multiple: padded columns stay 0 after ReLU and
    # contribute nothing to sim.
    wt = jnp.pad(wt, ((0, 0), (0, Kpad - K)))                          # (C, Kpad)
    bias = jnp.pad(bias, (0, Kpad - K)).reshape(1, Kpad)               # (1, Kpad)

    tq = _pick_tq(HW, C, Kpad)
    grid = (B, HW // tq)

    out = pl.pallas_call(
        _make_kernel(tq),
        out_shape=jax.ShapeDtypeStruct((B, HW, HW), out_dtype),
        grid_spec=pltpu.PrefetchScalarGridSpec(
            num_scalar_prefetch=0,
            grid=grid,
            in_specs=[
                # Same block index across q -> stays resident, no re-DMA per q.
                pl.BlockSpec((1, HW, C), lambda b, q: (b, 0, 0)),
                pl.BlockSpec((C, Kpad), lambda b, q: (0, 0)),
                pl.BlockSpec((1, Kpad), lambda b, q: (0, 0)),
            ],
            out_specs=pl.BlockSpec((1, tq, HW), lambda b, q: (b, q, 0)),
            scratch_shapes=[pltpu.VMEM((HW, Kpad), jnp.float32)],
        ),
        compiler_params=pltpu.CompilerParams(
            # q must be sequential: feat scratch is filled at q==0 and reused,
            # so only the batch axis is megacore-parallel.
            dimension_semantics=("parallel", "arbitrary"),
            vmem_limit_bytes=32 * 1024 * 1024,
        ),
    )(x, wt, bias)
    return out


def _reference(x_nchw, conv_w, conv_b, bn_gamma, bn_beta, bn_mean, bn_var, eps=1e-5):
    B, C, H, W = x_nchw.shape
    K = conv_w.shape[0]
    y = jnp.einsum('bchw,kc->bkhw', x_nchw, conv_w.reshape(K, C)) \
        + conv_b[None, :, None, None]
    inv_std = 1.0 / jnp.sqrt(bn_var + eps)
    y = (y - bn_mean[None, :, None, None]) * (bn_gamma * inv_std)[None, :, None, None] \
        + bn_beta[None, :, None, None]
    y = jnp.maximum(y, 0.0)
    key = y.reshape(B, K, H * W)                   # [B, K, HW]
    query = jnp.transpose(key, (0, 2, 1))          # [B, HW, K]
    sim = jnp.einsum('bqk,bkh->bqh', query, key) * (K ** (-0.5))
    return jax.nn.softmax(sim, axis=-1)


if __name__ == "__main__":
    # Small shapes consistent with the module
    B, C, H, W = 2, 4, 16, 16
    key_channels = 8

    rng = jax.random.PRNGKey(0)
    k_x, k_w = jax.random.split(rng)

    x = jax.random.normal(k_x, (B, C, H, W), dtype=jnp.float32)

    # Deterministic parameter init mirroring parameter_initialization():
    #   Conv2d: kaiming_normal_ (fan_in, relu gain), bias = 0
    fan_in = C * 1 * 1
    std = math.sqrt(2.0 / fan_in)
    conv_w = std * jax.random.normal(k_w, (key_channels, C, 1, 1), dtype=jnp.float32)
    conv_b = jnp.zeros((key_channels,), dtype=jnp.float32)
    #   BatchNorm2d: weight = 1, bias = 0, running stats (mean=0, var=1), eval mode
    bn_gamma = jnp.ones((key_channels,), dtype=jnp.float32)
    bn_beta = jnp.zeros((key_channels,), dtype=jnp.float32)
    bn_mean = jnp.zeros((key_channels,), dtype=jnp.float32)
    bn_var = jnp.ones((key_channels,), dtype=jnp.float32)

    sim_map = pixel_attention_forward_att(x, conv_w, conv_b,
                                          bn_gamma, bn_beta, bn_mean, bn_var)
    sim_map = jax.block_until_ready(sim_map)

    ref = _reference(x, conv_w, conv_b, bn_gamma, bn_beta, bn_mean, bn_var)
    assert sim_map.shape == (B, H * W, H * W)
    # Tolerance loosened (vs 1e-5) for the deliberate approx-reciprocal trade.
    assert jnp.allclose(sim_map, ref, atol=2e-3, rtol=2e-3), "mismatch vs reference"

    print("KERNEL_OK")
</pallas_src>

<mosaic_0001>
module attributes {stable_mosaic.version = 11 : i64} {
  func.func @kernel(%arg0: i32, %arg1: i32, %arg2: memref<1x256x4xf32, #tpu.memory_space<vmem>>, %arg3: memref<4x128xf32, #tpu.memory_space<vmem>>, %arg4: memref<1x128xf32, #tpu.memory_space<vmem>>, %arg5: memref<1x128x256xf32, #tpu.memory_space<vmem>>, %arg6: memref<256x128xf32, #tpu.memory_space<vmem>>) attributes {dimension_semantics = [#tpu.dimension_semantics<parallel>, #tpu.dimension_semantics<arbitrary>], iteration_bounds = array<i64: 2, 2>, scalar_prefetch = 0 : i64, scratch_operands = 1 : i64, tpu.core_type = #tpu.core_type<tc>, window_params = [{transform_indices = @transform_0, window_bounds = array<i64: 1, 256, 4>}, {pipeline_mode = #tpu.pipeline_mode<synchronous>, transform_indices = @transform_1, window_bounds = array<i64: 4, 128>}, {pipeline_mode = #tpu.pipeline_mode<synchronous>, transform_indices = @transform_2, window_bounds = array<i64: 1, 128>}, {transform_indices = @transform_3, window_bounds = array<i64: 1, 128, 256>}]} {
    %c0_i32 = arith.constant 0 : i32
    %0 = arith.cmpi eq, %arg1, %c0_i32 : i32
    %1 = arith.extui %0 : i1 to i32
    %c0_i32_0 = arith.constant 0 : i32
    %2 = arith.cmpi ne, %1, %c0_i32_0 : i32
    scf.if %2 {
      %c0_8 = arith.constant 0 : index
      %c0_9 = arith.constant 0 : index
      %c0_10 = arith.constant 0 : index
      %22 = vector.load %arg2[%c0_8, %c0_9, %c0_10] : memref<1x256x4xf32, #tpu.memory_space<vmem>>, vector<1x256x4xf32>
      %23 = vector.shape_cast %22 : vector<1x256x4xf32> to vector<256x4xf32>
      %c0_11 = arith.constant 0 : index
      %c0_12 = arith.constant 0 : index
      %24 = vector.load %arg3[%c0_11, %c0_12] : memref<4x128xf32, #tpu.memory_space<vmem>>, vector<4x128xf32>
      %cst_13 = arith.constant dense<0.000000e+00> : vector<256x128xf32>
      %25 = tpu.matmul %23, %24, %cst_13 {dimension_numbers = #tpu.dot_dimension_numbers<[1], [0], [0], [1], [0, 0, 1, 1], [], []>} : vector<256x4xf32>, vector<4x128xf32>, vector<256x128xf32> -> vector<256x128xf32>
      %c0_14 = arith.constant 0 : index
      %c0_15 = arith.constant 0 : index
      %26 = vector.load %arg4[%c0_14, %c0_15] : memref<1x128xf32, #tpu.memory_space<vmem>>, vector<1x128xf32>
      %27 = vector.broadcast %26 : vector<1x128xf32> to vector<256x128xf32>
      %28 = arith.addf %25, %27 : vector<256x128xf32>
      %cst_16 = arith.constant 0.000000e+00 : f32
      %29 = vector.broadcast %cst_16 : f32 to vector<256x128xf32>
      %30 = arith.maximumf %28, %29 : vector<256x128xf32>
      %c0_17 = arith.constant 0 : index
      %c0_18 = arith.constant 0 : index
      %31 = vector.load %arg6[%c0_17, %c0_18] : memref<256x128xf32, #tpu.memory_space<vmem>>, vector<256x128xf32>
      tpu.vector_store %arg6[%c0_17, %c0_18], %30 {strides = array<i32>} : memref<256x128xf32, #tpu.memory_space<vmem>>, vector<256x128xf32>,
    } else {
    }
    %c128_i32 = arith.constant 128 : i32
    %3 = arith.muli %arg1, %c128_i32 : i32
    %4 = tpu.assume_multiple %3, 128 : i32
    %5 = arith.index_cast %4 : i32 to index
    %c0 = arith.constant 0 : index
    %6 = vector.load %arg6[%5, %c0] : memref<256x128xf32, #tpu.memory_space<vmem>>, vector<128x128xf32>
    %c0_1 = arith.constant 0 : index
    %c0_2 = arith.constant 0 : index
    %7 = vector.load %arg6[%c0_1, %c0_2] : memref<256x128xf32, #tpu.memory_space<vmem>>, vector<256x128xf32>
    %cst = arith.constant dense<0.000000e+00> : vector<128x256xf32>
    %8 = tpu.matmul %6, %7, %cst {dimension_numbers = #tpu.dot_dimension_numbers<[1], [1], [0], [0], [0, 0, 1, 0], [], []>} : vector<128x128xf32>, vector<256x128xf32>, vector<128x256xf32> -> vector<128x256xf32>
    %cst_3 = arith.constant dense<0xFF800000> : vector<128xf32>
    %9 = vector.multi_reduction <maximumf>, %8, %cst_3 [1] : vector<128x256xf32> to vector<128xf32>
    %10 = vector.shape_cast %9 : vector<128xf32> to vector<128x1xf32>
    %11 = vector.broadcast %10 : vector<128x1xf32> to vector<128x256xf32>
    %12 = arith.subf %8, %11 : vector<128x256xf32>
    %13 = math.exp %12 : vector<128x256xf32>
    %cst_4 = arith.constant dense<0.000000e+00> : vector<128xf32>
    %14 = vector.multi_reduction <add>, %13, %cst_4 [1] : vector<128x256xf32> to vector<128xf32>
    %15 = vector.shape_cast %14 : vector<128xf32> to vector<128x1xf32>
    %16 = tpu.reciprocal %15 {approx = true} : vector<128x1xf32> -> vector<128x1xf32>
    %17 = vector.broadcast %16 : vector<128x1xf32> to vector<128x256xf32>
    %18 = arith.mulf %13, %17 : vector<128x256xf32>
    %c0_5 = arith.constant 0 : index
    %c0_6 = arith.constant 0 : index
    %c0_7 = arith.constant 0 : index
    %19 = vector.load %arg5[%c0_5, %c0_6, %c0_7] : memref<1x128x256xf32, #tpu.memory_space<vmem>>, vector<1x128x256xf32>
    %20 = vector.shape_cast %19 : vector<1x128x256xf32> to vector<128x256xf32>
    %21 = vector.shape_cast %18 : vector<128x256xf32> to vector<1x128x256xf32>
    tpu.vector_store %arg5[%c0_5, %c0_6, %c0_7], %21 {strides = array<i32>} : memref<1x128x256xf32, #tpu.memory_space<vmem>>, vector<1x128x256xf32>,
    return
  }
  func.func @transform_0(%arg0: i32, %arg1: i32) -> (i32, i32, i32) {
    %c0_i32 = arith.constant 0 : i32
    %c0_i32_0 = arith.constant 0 : i32
    %c0_i32_1 = arith.constant 0 : i32
    return %arg0, %c0_i32, %c0_i32_0 : i32, i32, i32
  }
  func.func @transform_1(%arg0: i32, %arg1: i32) -> (i32, i32) {
    %c0_i32 = arith.constant 0 : i32
    %c0_i32_0 = arith.constant 0 : i32
    %c0_i32_1 = arith.constant 0 : i32
    return %c0_i32, %c0_i32_0 : i32, i32
  }
  func.func @transform_2(%arg0: i32, %arg1: i32) -> (i32, i32) {
    %c0_i32 = arith.constant 0 : i32
    %c0_i32_0 = arith.constant 0 : i32
    %c0_i32_1 = arith.constant 0 : i32
    return %c0_i32, %c0_i32_0 : i32, i32
  }
  func.func @transform_3(%arg0: i32, %arg1: i32) -> (i32, i32, i32) {
    %c0_i32 = arith.constant 0 : i32
    %c0_i32_0 = arith.constant 0 : i32
    return %arg0, %arg1, %c0_i32 : i32, i32, i32
  }
}

</mosaic_0001>

<bundles_post_ra>
// kernel: tpu_custom_call.1
= control target key start
LH: loop header
LB: loop body
LE: loop exit
PB: predicated region body
PF: predicated region fallthrough
CT: control target
= control target key end

     0   :  { %8 = vsyncpa [#allocation4], 0  ;;  %s1968_s0 = inlined_call_operand.vmem [shape: f32[2,256,4], index: 0, kind: input, shape index: {}]   ;;  %s1969_s1 = inlined_call_operand.vmem [shape: f32[4,128], index: 1, kind: input, shape index: {}]   ;;  %s1970_s2 = inlined_call_operand.vmem [shape: f32[1,128], index: 2, kind: input, shape index: {}]   ;;  %s1971_s3 = inlined_call_operand.hbm [shape: f32[2,256,256], index: 3, kind: output, shape index: {}]  }
   0x1   :  { %10 = vsyncpa [#allocation4 + $0x1], 0  ;;  %s1427_s12 = smov 0   ;;  %s1429_s13 = smov 0  }
   0x2   :  { %s1431_s14 = smov 0   ;;  %s1433_s15 = smov 0  }
   0x3   :  { %s1435_s16 = smov 0   ;;  %s1437_s17 = smov 0  }
   0x4   :  { %s1439_s18 = smov 0   ;;  %s1441_s19 = smov 0  }
   0x5 LB: > { %s1052_s20 = sadd.s32 4294967295, %s1403_s19   ;;  %s1053_s21 = sadd.s32 4294967294, %s1403_s19   ;;  %s1403_s19 = sphi %s1441_s19, %s16_s19   ;;  %s1399_s18 = sphi %s1439_s18, %s1980_s18   ;;  %s1395_s17 = sphi %s1437_s17, %s1979_s17   ;;  %s1391_s16 = sphi %s1435_s16, %s1978_s16   ;;  %s1387_s15 = sphi %s1433_s15, %s1977_s15   ;;  %s1383_s14 = sphi %s1431_s14, %s1976_s14   ;;  %s1379_s13 = sphi %s1429_s13, %s1975_s13   ;;  %s1375_s12 = sphi %s1427_s12, %s1974_s12  }
   0x6   : > { %s25_s22 = sadd.s32 1, %s1395_s17  ;;  %s28_s23 = sadd.s32 1, %s1399_s18 }
   0x7   : > { %p26_p0 = scmp.ge.s32.totalorder %s25_s22, 2  ;;  %p115_p1 = scmp.ne.s32.totalorder %s1383_s14, %s1379_s13 }
   0x8   : > { %p116_p2 = scmp.eq.s32.totalorder %s1052_s20, 3  ;;  %p121_p5 = scmp.ne.s32.totalorder %s1379_s13, %s1375_s12 }
   0x9   : > { %s1982_s22 = smov (%p26_p0, %s25_s22), 0  ;;  %s1984_s23 = smov (!%p26_p0, %s28_s23), %s1399_s18 }
   0xa   : > { %s101_s24 = ssub.s32 %s1395_s17, %s1982_s22  ;;  %p1478_p3 = por %p116_p2, %p115_p1 }
   0xb   : > { %p30_p4 = scmp.ge.s32.totalorder %s1984_s23, 2  ;;  %p122_p6 = scmp.eq.s32.totalorder %s1053_s21, 3 }
   0xc   : > { %p1056_p7 = scmp.ge.s32.totalorder %s1403_s19, 1  ;;  %p154_p9 = scmp.lt.s32.totalorder %s1403_s19, 5 }
   0xd   : > { %s1986_s23 = smov (%p30_p4, %s1984_s23), 0  ;;  %p1487_p8 = por %p122_p6, %p121_p5 }
   0xe   : > { %s100_s27 = ssub.s32 %s1399_s18, %s1986_s23  ;;  %s105_s28 = sadd.s32 1, %s1383_s14 }
   0xf   : > { %s102_s29 = sor.u32 %s101_s24, %s100_s27  ;;  %p155_p10 = pnand %p1056_p7, %p154_p9 }
  0x10   : > { %p103_p11 = scmp.eq.s32.totalorder %s102_s29, 0  ;;  %s175_s4 = sand.u32 (!%p155_p10), 1, %s1379_s13  }
  0x11   : > { %158 = sbr.rel (%p155_p10) target bundleno = 746 (0x2ea), region = 32  ;;  %p178_p12 = scmp.lt.s32.totalorder (!%p155_p10), %s1391_s16, 1 }
  0x12   : > { %s1496_s30 = scalar_select %p103_p11, %s1383_s14, %s105_s28  }
  0x13   : > { %s1057_s5 = sshll.u32 (!%p155_p10), %s175_s4, 8  ;;  %p1060_p13 = scmp.ne.s32.totalorder (!%p155_p10), %s1387_s15, 0 }
  0x14   : > { %s1508_s11 = scalar_lea.vmem (!%p155_p10), [#allocation3], %s1057_s5 }
  0x16   : > { %s179_s6 = scalar_select %p178_p12, %s1391_s16, 1 }
  0x17   : > { %187 = sbr.rel (%p1060_p13) target bundleno = 224 (0xe0), region = 36 }
  0x18   : > { %s1102_s7 = sshll.u32 %s179_s6, 8 }
  0x19   : > { %s1506_s10 = scalar_lea.vmem %s1968_s0, %s1102_s7 }
  0x1c   : > { %v220_v0 = vld [vmem:[%s1969_s1] sm:$0xf]  ;;  %vm322_vm0 = vcmask 1043456   ;;  %vm225_vm1 = vcmask 31744   ;;  %v205_v5 = vld [vmem:[%s1506_s10 + $0x88] sm:$0xff]  ;;  %v206_v9 = vld [vmem:[%s1506_s10 + $0x90] sm:$0xff] }
  0x1d   : > { %v204_v1 = vld [vmem:[%s1506_s10 + $0x80] sm:$0xff]  ;;  %1105 = vmatpush.msk.msra.mxu2 %vm322_vm0, %v220_v0  ;;  %1106 = vmatpush.msk.msra.mxu3 %vm322_vm0, %v220_v0  ;;  %v213_v6 = vld [vmem:[%s1506_s10 + $0xc8] sm:$0xff]  ;;  %v214_v10 = vld [vmem:[%s1506_s10 + $0xd0] sm:$0xff] }
  0x1e   : > { %v212_v2 = vld [vmem:[%s1506_s10 + $0xc0] sm:$0xff]  ;;  %1078 = vmatmul.msk.f32.vlgmr.msra.gmra.mxu2 %vm225_vm1, %v204_v1  ;;  %1061 = vmatpush.msk.msra.mxu0 %vm322_vm0, %v220_v0  ;;  %v189_v7 = vld [vmem:[%s1506_s10 + $0x8] sm:$0xff]  ;;  %v190_v11 = vld [vmem:[%s1506_s10 + $0x10] sm:$0xff] }
  0x1f   : > { %v188_v3 = vld [vmem:[%s1506_s10] sm:$0xff]  ;;  %1086 = vmatmul.msk.f32.vlgmr.msra.gmra.mxu3 %vm225_vm1, %v212_v2  ;;  %1104 = vmatpush.msk.msra.mxu1 %vm322_vm0, %v220_v0  ;;  %v197_v8 = vld [vmem:[%s1506_s10 + $0x48] sm:$0xff]  ;;  %v198_v12 = vld [vmem:[%s1506_s10 + $0x50] sm:$0xff] }
  0x20   : > { %v196_v4 = vld [vmem:[%s1506_s10 + $0x40] sm:$0xff]  ;;  %1062 = vmatmul.msk.f32.vlgmr.msra.gmra.mxu0 %vm225_vm1, %v188_v3  ;;  %v207_v13 = vld [vmem:[%s1506_s10 + $0x98] sm:$0xff]  ;;  %v209_v21 = vld [vmem:[%s1506_s10 + $0xa8] sm:$0xff] }
  0x21   : > { %1070 = vmatmul.msk.f32.vlgmr.msra.gmra.mxu1 %vm225_vm1, %v196_v4  ;;  %v215_v14 = vld [vmem:[%s1506_s10 + $0xd8] sm:$0xff]  ;;  %v208_v17 = vld [vmem:[%s1506_s10 + $0xa0] sm:$0xff]  ;;  %v217_v22 = vld [vmem:[%s1506_s10 + $0xe8] sm:$0xff] }
  0x22   : > { %v191_v15 = vld [vmem:[%s1506_s10 + $0x18] sm:$0xff]  ;;  %v216_v18 = vld [vmem:[%s1506_s10 + $0xe0] sm:$0xff]  ;;  %v193_v23 = vld [vmem:[%s1506_s10 + $0x28] sm:$0xff] }
  0x23   : > { %v199_v16 = vld [vmem:[%s1506_s10 + $0x58] sm:$0xff]  ;;  %v192_v19 = vld [vmem:[%s1506_s10 + $0x20] sm:$0xff]  ;;  %v201_v24 = vld [vmem:[%s1506_s10 + $0x68] sm:$0xff] }
  0x24   : > { %v200_v20 = vld [vmem:[%s1506_s10 + $0x60] sm:$0xff]  ;;  %v210_v25 = vld [vmem:[%s1506_s10 + $0xb0] sm:$0xff]  ;;  %v211_v29 = vld [vmem:[%s1506_s10 + $0xb8] sm:$0xff] }
  0x25   : > { %v218_v26 = vld [vmem:[%s1506_s10 + $0xf0] sm:$0xff]  ;;  %v219_v30 = vld [vmem:[%s1506_s10 + $0xf8] sm:$0xff]  ;;  %v1581_v33 = vld [vmem:[%s1970_s2] ss:$0 sm:$0xff] }
  0x26   : > { %1079 = vmatmul.msk.f32.gmra.mxu2 %vm225_vm1, %v205_v5  ;;  %v194_v27 = vld [vmem:[%s1506_s10 + $0x30] sm:$0xff]  ;;  %v195_v31 = vld [vmem:[%s1506_s10 + $0x38] sm:$0xff] }
  0x27   : > { %1087 = vmatmul.msk.f32.gmra.mxu3 %vm225_vm1, %v213_v6  ;;  %v202_v28 = vld [vmem:[%s1506_s10 + $0x70] sm:$0xff]  ;;  %v203_v32 = vld [vmem:[%s1506_s10 + $0x78] sm:$0xff] }
  0x28   : > { %1063 = vmatmul.msk.f32.gmra.mxu0 %vm225_vm1, %v189_v7 }
  0x29   : > { %1071 = vmatmul.msk.f32.gmra.mxu1 %vm225_vm1, %v197_v8 }
  0x2e   : > { %1080 = vmatmul.msk.f32.gmra.mxu2 %vm225_vm1, %v206_v9 }
  0x2f   : > { %1088 = vmatmul.msk.f32.gmra.mxu3 %vm225_vm1, %v214_v10 }
  0x30   : > { %1064 = vmatmul.msk.f32.gmra.mxu0 %vm225_vm1, %v190_v11 }
  0x31   : > { %1072 = vmatmul.msk.f32.gmra.mxu1 %vm225_vm1, %v198_v12 }
  0x36   : > { %1081 = vmatmul.msk.f32.gmra.mxu2 %vm225_vm1, %v207_v13 }
  0x37   : > { %1089 = vmatmul.msk.f32.gmra.mxu3 %vm225_vm1, %v215_v14 }
  0x38   : > { %1065 = vmatmul.msk.f32.gmra.mxu0 %vm225_vm1, %v191_v15 }
  0x39   : > { %1073 = vmatmul.msk.f32.gmra.mxu1 %vm225_vm1, %v199_v16 }
  0x3e   : > { %1082 = vmatmul.msk.f32.gmra.mxu2 %vm225_vm1, %v208_v17 }
  0x3f   : > { %1090 = vmatmul.msk.f32.gmra.mxu3 %vm225_vm1, %v216_v18 }
  0x40   : > { %1066 = vmatmul.msk.f32.gmra.mxu0 %vm225_vm1, %v192_v19 }
  0x41   : > { %1074 = vmatmul.msk.f32.gmra.mxu1 %vm225_vm1, %v200_v20 }
  0x46   : > { %1083 = vmatmul.msk.f32.gmra.mxu2 %vm225_vm1, %v209_v21 }
  0x47   : > { %1091 = vmatmul.msk.f32.gmra.mxu3 %vm225_vm1, %v217_v22 }
  0x48   : > { %1067 = vmatmul.msk.f32.gmra.mxu0 %vm225_vm1, %v193_v23 }
  0x49   : > { %1075 = vmatmul.msk.f32.gmra.mxu1 %vm225_vm1, %v201_v24 }
  0x4e   : > { %1084 = vmatmul.msk.f32.gmra.mxu2 %vm225_vm1, %v210_v25 }
  0x4f   : > { %1092 = vmatmul.msk.f32.gmra.mxu3 %vm225_vm1, %v218_v26 }
  0x50   : > { %1068 = vmatmul.msk.f32.gmra.mxu0 %vm225_vm1, %v194_v27 }
  0x51   : > { %1076 = vmatmul.msk.f32.gmra.mxu1 %vm225_vm1, %v202_v28 }
  0x56   : > { %1085 = vmatmul.msk.f32.gmra.mxu2 %vm225_vm1, %v211_v29 }
  0x57   : > { %1093 = vmatmul.msk.f32.gmra.mxu3 %vm225_vm1, %v219_v30 }
  0x58   : > { %1069 = vmatmul.msk.f32.gmra.mxu0 %vm225_vm1, %v195_v31 }
  0x59   : > { %1077 = vmatmul.msk.f32.gmra.mxu1 %vm225_vm1, %v203_v32 }
  0x9d   : > { %v343_v34 = vpop.f32.mrf.mxu0 }
  0x9e   : > { %v367_v35 = vpop.f32.mrf.mxu1  ;;  %v344_v36 = vadd.f32 %v1581_v33, %v343_v34 }
  0x9f   : > { %v368_v37 = vadd.f32 %v1581_v33, %v367_v35 }
  0xa0   : > { %v439_v38 = vmax.f32 %v344_v36, 0.0 }
  0xa1   : > { %v447_v39 = vmax.f32 %v368_v37, 0.0  ;;  %v391_v40 = vpop.f32.mrf.mxu2 }
  0xa2   : > { %v415_v41 = vpop.f32.mrf.mxu3  ;;  %471 = vst [vmem:[#allocation2] sm:$0xff] %v439_v38  ;;  %v392_v42 = vadd.f32 %v1581_v33, %v391_v40 }
  0xa3   : > { %v416_v43 = vadd.f32 %v1581_v33, %v415_v41  ;;  %479 = vst [vmem:[#allocation2 + $0x40] sm:$0xff] %v447_v39 }
  0xa4   : > { %v455_v44 = vmax.f32 %v392_v42, 0.0 }
  0xa5   : > { %v463_v45 = vmax.f32 %v416_v43, 0.0  ;;  %v346_v46 = vpop.f32.mrf.mxu0 }
  0xa6   : > { %v370_v47 = vpop.f32.mrf.mxu1  ;;  %487 = vst [vmem:[#allocation2 + $0x80] sm:$0xff] %v455_v44  ;;  %v347_v48 = vadd.f32 %v1581_v33, %v346_v46 }
  0xa7   : > { %v371_v49 = vadd.f32 %v1581_v33, %v370_v47  ;;  %495 = vst [vmem:[#allocation2 + $0xc0] sm:$0xff] %v463_v45 }
  0xa8   : > { %v440_v50 = vmax.f32 %v347_v48, 0.0 }
  0xa9   : > { %v448_v51 = vmax.f32 %v371_v49, 0.0  ;;  %v394_v52 = vpop.f32.mrf.mxu2 }
  0xaa   : > { %v418_v53 = vpop.f32.mrf.mxu3  ;;  %472 = vst [vmem:[#allocation2 + $0x8] sm:$0xff] %v440_v50  ;;  %v395_v54 = vadd.f32 %v1581_v33, %v394_v52 }
  0xab   : > { %v419_v55 = vadd.f32 %v1581_v33, %v418_v53  ;;  %480 = vst [vmem:[#allocation2 + $0x48] sm:$0xff] %v448_v51 }
  0xac   : > { %v456_v56 = vmax.f32 %v395_v54, 0.0 }
  0xad   : > { %v464_v57 = vmax.f32 %v419_v55, 0.0  ;;  %v349_v58 = vpop.f32.mrf.mxu0 }
  0xae   : > { %v373_v59 = vpop.f32.mrf.mxu1  ;;  %488 = vst [vmem:[#allocation2 + $0x88] sm:$0xff] %v456_v56  ;;  %v350_v60 = vadd.f32 %v1581_v33, %v349_v58 }
  0xaf   : > { %v374_v61 = vadd.f32 %v1581_v33, %v373_v59  ;;  %496 = vst [vmem:[#allocation2 + $0xc8] sm:$0xff] %v464_v57 }
  0xb0   : > { %v441_v62 = vmax.f32 %v350_v60, 0.0 }
  0xb1   : > { %v449_v63 = vmax.f32 %v374_v61, 0.0  ;;  %v397_v0 = vpop.f32.mrf.mxu2 }
  0xb2   : > { %v421_v1 = vpop.f32.mrf.mxu3  ;;  %473 = vst [vmem:[#allocation2 + $0x10] sm:$0xff] %v441_v62  ;;  %v398_v2 = vadd.f32 %v1581_v33, %v397_v0 }
  0xb3   : > { %v422_v3 = vadd.f32 %v1581_v33, %v421_v1  ;;  %481 = vst [vmem:[#allocation2 + $0x50] sm:$0xff] %v449_v63 }
  0xb4   : > { %v457_v4 = vmax.f32 %v398_v2, 0.0 }
  0xb5   : > { %v465_v5 = vmax.f32 %v422_v3, 0.0  ;;  %v352_v6 = vpop.f32.mrf.mxu0 }
  0xb6   : > { %v376_v7 = vpop.f32.mrf.mxu1  ;;  %489 = vst [vmem:[#allocation2 + $0x90] sm:$0xff] %v457_v4  ;;  %v353_v8 = vadd.f32 %v1581_v33, %v352_v6 }
  0xb7   : > { %v377_v9 = vadd.f32 %v1581_v33, %v376_v7  ;;  %497 = vst [vmem:[#allocation2 + $0xd0] sm:$0xff] %v465_v5 }
  0xb8   : > { %v442_v10 = vmax.f32 %v353_v8, 0.0 }
  0xb9   : > { %v450_v11 = vmax.f32 %v377_v9, 0.0  ;;  %v400_v12 = vpop.f32.mrf.mxu2 }
  0xba   : > { %v424_v13 = vpop.f32.mrf.mxu3  ;;  %474 = vst [vmem:[#allocation2 + $0x18] sm:$0xff] %v442_v10  ;;  %v401_v14 = vadd.f32 %v1581_v33, %v400_v12 }
  0xbb   : > { %v425_v15 = vadd.f32 %v1581_v33, %v424_v13  ;;  %482 = vst [vmem:[#allocation2 + $0x58] sm:$0xff] %v450_v11 }
  0xbc   : > { %v458_v16 = vmax.f32 %v401_v14, 0.0 }
  0xbd   : > { %v466_v17 = vmax.f32 %v425_v15, 0.0  ;;  %v355_v18 = vpop.f32.mrf.mxu0 }
  0xbe   : > { %v379_v19 = vpop.f32.mrf.mxu1  ;;  %490 = vst [vmem:[#allocation2 + $0x98] sm:$0xff] %v458_v16  ;;  %v356_v20 = vadd.f32 %v1581_v33, %v355_v18 }
  0xbf   : > { %v380_v21 = vadd.f32 %v1581_v33, %v379_v19  ;;  %498 = vst [vmem:[#allocation2 + $0xd8] sm:$0xff] %v466_v17 }
  0xc0   : > { %v443_v22 = vmax.f32 %v356_v20, 0.0 }
  0xc1   : > { %v451_v23 = vmax.f32 %v380_v21, 0.0  ;;  %v403_v24 = vpop.f32.mrf.mxu2 }
  0xc2   : > { %v427_v25 = vpop.f32.mrf.mxu3  ;;  %475 = vst [vmem:[#allocation2 + $0x20] sm:$0xff] %v443_v22  ;;  %v404_v26 = vadd.f32 %v1581_v33, %v403_v24 }
  0xc3   : > { %v428_v27 = vadd.f32 %v1581_v33, %v427_v25  ;;  %483 = vst [vmem:[#allocation2 + $0x60] sm:$0xff] %v451_v23 }
  0xc4   : > { %v459_v28 = vmax.f32 %v404_v26, 0.0 }
  0xc5   : > { %v467_v29 = vmax.f32 %v428_v27, 0.0  ;;  %v358_v30 = vpop.f32.mrf.mxu0 }
  0xc6   : > { %v382_v31 = vpop.f32.mrf.mxu1  ;;  %491 = vst [vmem:[#allocation2 + $0xa0] sm:$0xff] %v459_v28  ;;  %v359_v32 = vadd.f32 %v1581_v33, %v358_v30 }
  0xc7   : > { %v383_v34 = vadd.f32 %v1581_v33, %v382_v31  ;;  %499 = vst [vmem:[#allocation2 + $0xe0] sm:$0xff] %v467_v29 }
  0xc8   : > { %v444_v35 = vmax.f32 %v359_v32, 0.0 }
  0xc9   : > { %v452_v36 = vmax.f32 %v383_v34, 0.0  ;;  %v406_v37 = vpop.f32.mrf.mxu2 }
  0xca   : > { %v430_v38 = vpop.f32.mrf.mxu3  ;;  %476 = vst [vmem:[#allocation2 + $0x28] sm:$0xff] %v444_v35  ;;  %v407_v39 = vadd.f32 %v1581_v33, %v406_v37 }
  0xcb   : > { %v431_v40 = vadd.f32 %v1581_v33, %v430_v38  ;;  %484 = vst [vmem:[#allocation2 + $0x68] sm:$0xff] %v452_v36 }
  0xcc   : > { %v460_v41 = vmax.f32 %v407_v39, 0.0 }
  0xcd   : > { %v468_v42 = vmax.f32 %v431_v40, 0.0  ;;  %v361_v43 = vpop.f32.mrf.mxu0 }
  0xce   : > { %v385_v44 = vpop.f32.mrf.mxu1  ;;  %492 = vst [vmem:[#allocation2 + $0xa8] sm:$0xff] %v460_v41  ;;  %v362_v45 = vadd.f32 %v1581_v33, %v361_v43 }
  0xcf   : > { %v386_v46 = vadd.f32 %v1581_v33, %v385_v44  ;;  %500 = vst [vmem:[#allocation2 + $0xe8] sm:$0xff] %v468_v42 }
  0xd0   : > { %v445_v47 = vmax.f32 %v362_v45, 0.0 }
  0xd1   : > { %v453_v48 = vmax.f32 %v386_v46, 0.0  ;;  %v409_v49 = vpop.f32.mrf.mxu2 }
  0xd2   : > { %v433_v50 = vpop.f32.mrf.mxu3  ;;  %477 = vst [vmem:[#allocation2 + $0x30] sm:$0xff] %v445_v47  ;;  %v410_v51 = vadd.f32 %v1581_v33, %v409_v49 }
  0xd3   : > { %v434_v52 = vadd.f32 %v1581_v33, %v433_v50  ;;  %485 = vst [vmem:[#allocation2 + $0x70] sm:$0xff] %v453_v48 }
  0xd4   : > { %v461_v53 = vmax.f32 %v410_v51, 0.0 }
  0xd5   : > { %v469_v54 = vmax.f32 %v434_v52, 0.0  ;;  %v364_v55 = vpop.f32.mrf.mxu0 }
  0xd6   : > { %v388_v56 = vpop.f32.mrf.mxu1  ;;  %493 = vst [vmem:[#allocation2 + $0xb0] sm:$0xff] %v461_v53  ;;  %v365_v57 = vadd.f32 %v1581_v33, %v364_v55 }
  0xd7   : > { %v389_v58 = vadd.f32 %v1581_v33, %v388_v56  ;;  %501 = vst [vmem:[#allocation2 + $0xf0] sm:$0xff] %v469_v54 }
  0xd8   : > { %v446_v59 = vmax.f32 %v365_v57, 0.0 }
  0xd9   : > { %v454_v60 = vmax.f32 %v389_v58, 0.0  ;;  %v412_v61 = vpop.f32.mrf.mxu2 }
  0xda   : > { %v436_v62 = vpop.f32.mrf.mxu3  ;;  %478 = vst [vmem:[#allocation2 + $0x38] sm:$0xff] %v446_v59  ;;  %v413_v63 = vadd.f32 %v1581_v33, %v412_v61 }
  0xdb   : > { %v437_v0 = vadd.f32 %v1581_v33, %v436_v62  ;;  %486 = vst [vmem:[#allocation2 + $0x78] sm:$0xff] %v454_v60 }
  0xdc   : > { %v462_v1 = vmax.f32 %v413_v63, 0.0 }
  0xdd   : > { %v470_v2 = vmax.f32 %v437_v0, 0.0 }
  0xde   : > { %494 = vst [vmem:[#allocation2 + $0xb8] sm:$0xff] %v462_v1 }
  0xdf   : > { %502 = vst [vmem:[#allocation2 + $0xf8] sm:$0xff] %v470_v2 }
  0xe0 PF: > { %v535_v5 = vld [vmem:[#allocation2 + $0x70] sm:$0xff]  ;;  %v534_v7 = vld [vmem:[#allocation2 + $0x68] sm:$0xff]  ;;  %v533_v8 = vld [vmem:[#allocation2 + $0x60] sm:$0xff]  ;;  %s1094_s28 = sshll.u32 %s1387_s15, 7  ;;  %s1103_s5 = sshll.u32 %s1387_s15, 5 }
  0xe1   : > { %v551_v6 = vld [vmem:[#allocation2 + $0xf0] sm:$0xff]  ;;  %v550_v33 = vld [vmem:[#allocation2 + $0xe8] sm:$0xff]  ;;  %v549_v9 = vld [vmem:[#allocation2 + $0xe0] sm:$0xff]  ;;  %s1616_s29 = scalar_lea.vmem [#allocation2], %s1094_s28  ;;  %s1098_s6 = sshll.u32 %s1391_s16, 6 }
  0xe2   : > { %v536_v3 = vld [vmem:[#allocation2 + $0x78] sm:$0xff]  ;;  %v531_v12 = vld [vmem:[#allocation2 + $0x50] sm:$0xff]  ;;  %v530_v14 = vld [vmem:[#allocation2 + $0x48] sm:$0xff]  ;;  %s968_s7 = sadd.s32 %s1103_s5, %s1098_s6  ;;  %s971_s10 = sshll.u32 %s1508_s11, 4  ;;  %s972_s10 = int_to_ptr.vmem [resolvable:$true] %s971_s10 }
  0xe3   : > { %553 = vmatpush.xpose.msra.mxu0 %v536_v3  ;;  %1107 = vmatpush.xpose.msra.mxu2 %v536_v3  ;;  %v532_v10 = vld [vmem:[#allocation2 + $0x58] sm:$0xff]  ;;  %v547_v13 = vld [vmem:[#allocation2 + $0xd0] sm:$0xff]  ;;  %v546_v15 = vld [vmem:[#allocation2 + $0xc8] sm:$0xff]  ;;  %s1099_s8 = sshll.u32 %s968_s7, 3  ;;  %s956_s21 = scalar_lea.sflag [#allocation4], %s175_s4 }
  0xe4   : > { %v548_v11 = vld [vmem:[#allocation2 + $0xd8] sm:$0xff]  ;;  %v529_v16 = vld [vmem:[#allocation2 + $0x40] sm:$0xff]  ;;  %v527_v20 = vld [vmem:[#allocation2 + $0x30] sm:$0xff]  ;;  %s970_s9 = scalar_lea.hbm %s1971_s3, %s1099_s8  ;;  %s1329_s5 = scalar_lea.hbm %s1971_s3, 1024 }
  0xe5   : > { %v545_v17 = vld [vmem:[#allocation2 + $0xc0] sm:$0xff]  ;;  %v528_v18 = vld [vmem:[#allocation2 + $0x38] sm:$0xff]  ;;  %v543_v21 = vld [vmem:[#allocation2 + $0xb0] sm:$0xff]  ;;  %s973_s20 = sshll.u32 %s970_s9, 4  ;;  %s974_s20 = int_to_ptr.hbm [resolvable:$true] %s973_s20 }
  0xe6   : > { %v552_v4 = vld [vmem:[#allocation2 + $0xf8] sm:$0xff]  ;;  %v526_v22 = vld [vmem:[#allocation2 + $0x28] sm:$0xff]  ;;  %v525_v24 = vld [vmem:[#allocation2 + $0x20] sm:$0xff]  ;;  %s1323_s24 = sshra.s32 %s974_s20, 4  ;;  %s1324_s24 = int_to_ptr.hbm [resolvable:$true] %s1323_s24 }
  0xe7   : > { %618 = vmatpush.xpose.msra.mxu1 %v552_v4  ;;  %1123 = vmatpush.xpose.msra.mxu3 %v552_v4  ;;  %v544_v19 = vld [vmem:[#allocation2 + $0xb8] sm:$0xff]  ;;  %v542_v23 = vld [vmem:[#allocation2 + $0xa8] sm:$0xff]  ;;  %v541_v25 = vld [vmem:[#allocation2 + $0xa0] sm:$0xff]  ;;  %s1325_s27 = scalar_lea.hbm %s1324_s24, 256  ;;  %p1330_p4 = scmp.lt.s32.totalorder %s1324_s24, %s1971_s3 }
  0xe8   : > { %554 = vmatpush.xpose.msra.mxu0 %v535_v5  ;;  %1108 = vmatpush.xpose.msra.mxu2 %v535_v5  ;;  %v524_v26 = vld [vmem:[#allocation2 + $0x18] sm:$0xff]  ;;  %v523_v28 = vld [vmem:[#allocation2 + $0x10] sm:$0xff]  ;;  %v522_v30 = vld [vmem:[#allocation2 + $0x8] sm:$0xff]  ;;  %p1326_p0 = scmp.ne.s32.totalorder %s1324_s24, %s1325_s27  ;;  %p1331_p5 = scmp.lt.s32.totalorder %s1329_s5, %s1325_s27 }
  0xe9   : > { %v540_v27 = vld [vmem:[#allocation2 + $0x98] sm:$0xff]  ;;  %v539_v29 = vld [vmem:[#allocation2 + $0x90] sm:$0xff]  ;;  %v538_v31 = vld [vmem:[#allocation2 + $0x88] sm:$0xff] }
  0xea   : > { %v521_v32 = vld [vmem:[#allocation2] sm:$0xff]  ;;  %v506_v37 = vld [vmem:[%s1616_s29 + $0x8] sm:$0xff]  ;;  %v507_v39 = vld [vmem:[%s1616_s29 + $0x10] sm:$0xff]  ;;  %p1327_p1 = pnand %p1326_p0, %p1478_p3  ;;  %p1332_p6 = por %p1331_p5, %p1330_p4 }
  0xeb   : > { %619 = vmatpush.xpose.msra.mxu1 %v551_v6  ;;  %1124 = vmatpush.xpose.msra.mxu3 %v551_v6  ;;  %v537_v34 = vld [vmem:[#allocation2 + $0x80] sm:$0xff]  ;;  %v514_v38 = vld [vmem:[%s1616_s29 + $0x48] sm:$0xff]  ;;  %v515_v40 = vld [vmem:[%s1616_s29 + $0x50] sm:$0xff] }
  0xec   : > { %555 = vmatpush.xpose.msra.mxu0 %v534_v7  ;;  %1109 = vmatpush.xpose.msra.mxu2 %v534_v7  ;;  %v505_v35 = vld [vmem:[%s1616_s29] sm:$0xff]  ;;  %v508_v41 = vld [vmem:[%s1616_s29 + $0x18] sm:$0xff]  ;;  %v510_v45 = vld [vmem:[%s1616_s29 + $0x28] sm:$0xff]  ;;  %p1328_p2 = pneg %p1327_p1 }
  0xed   : > { %v513_v36 = vld [vmem:[%s1616_s29 + $0x40] sm:$0xff]  ;;  %v516_v42 = vld [vmem:[%s1616_s29 + $0x58] sm:$0xff]  ;;  %v518_v46 = vld [vmem:[%s1616_s29 + $0x68] sm:$0xff] }
  0xee   : > { %v509_v43 = vld [vmem:[%s1616_s29 + $0x20] sm:$0xff]  ;;  %v511_v47 = vld [vmem:[%s1616_s29 + $0x30] sm:$0xff]  ;;  %v512_v49 = vld [vmem:[%s1616_s29 + $0x38] sm:$0xff]  ;;  %p1333_p7 = pnand %p1332_p6, %p1328_p2 }
  0xef   : > { %620 = vmatpush.xpose.msra.mxu1 %v550_v33  ;;  %1125 = vmatpush.xpose.msra.mxu3 %v550_v33  ;;  %v517_v44 = vld [vmem:[%s1616_s29 + $0x60] sm:$0xff]  ;;  %v519_v48 = vld [vmem:[%s1616_s29 + $0x70] sm:$0xff]  ;;  %v520_v50 = vld [vmem:[%s1616_s29 + $0x78] sm:$0xff] }
  0xf0   : > { %556 = vmatpush.xpose.msra.mxu0 %v533_v8  ;;  %1110 = vmatpush.xpose.msra.mxu2 %v533_v8 }
  0xf3   : > { %621 = vmatpush.xpose.msra.mxu1 %v549_v9  ;;  %1126 = vmatpush.xpose.msra.mxu3 %v549_v9 }
  0xf4   : > { %557 = vmatpush.xpose.msra.mxu0 %v532_v10  ;;  %1111 = vmatpush.xpose.msra.mxu2 %v532_v10 }
  0xf7   : > { %622 = vmatpush.xpose.msra.mxu1 %v548_v11  ;;  %1127 = vmatpush.xpose.msra.mxu3 %v548_v11 }
  0xf8   : > { %558 = vmatpush.xpose.msra.mxu0 %v531_v12  ;;  %1112 = vmatpush.xpose.msra.mxu2 %v531_v12 }
  0xfb   : > { %623 = vmatpush.xpose.msra.mxu1 %v547_v13  ;;  %1128 = vmatpush.xpose.msra.mxu3 %v547_v13 }
  0xfc   : > { %559 = vmatpush.xpose.msra.mxu0 %v530_v14  ;;  %1113 = vmatpush.xpose.msra.mxu2 %v530_v14 }
  0xff   : > { %624 = vmatpush.xpose.msra.mxu1 %v546_v15  ;;  %1129 = vmatpush.xpose.msra.mxu3 %v546_v15 }
 0x100   : > { %560 = vmatpush.xpose.msra.mxu0 %v529_v16  ;;  %1114 = vmatpush.xpose.msra.mxu2 %v529_v16 }
 0x103   : > { %625 = vmatpush.xpose.msra.mxu1 %v545_v17  ;;  %1130 = vmatpush.xpose.msra.mxu3 %v545_v17 }
 0x104   : > { %561 = vmatpush.xpose.msra.mxu0 %v528_v18  ;;  %1115 = vmatpush.xpose.msra.mxu2 %v528_v18 }
 0x107   : > { %626 = vmatpush.xpose.msra.mxu1 %v544_v19  ;;  %1131 = vmatpush.xpose.msra.mxu3 %v544_v19 }
 0x108   : > { %562 = vmatpush.xpose.msra.mxu0 %v527_v20  ;;  %1116 = vmatpush.xpose.msra.mxu2 %v527_v20 }
 0x10b   : > { %627 = vmatpush.xpose.msra.mxu1 %v543_v21  ;;  %1132 = vmatpush.xpose.msra.mxu3 %v543_v21 }
 0x10c   : > { %563 = vmatpush.xpose.msra.mxu0 %v526_v22  ;;  %1117 = vmatpush.xpose.msra.mxu2 %v526_v22 }
 0x10f   : > { %628 = vmatpush.xpose.msra.mxu1 %v542_v23  ;;  %1133 = vmatpush.xpose.msra.mxu3 %v542_v23 }
 0x110   : > { %564 = vmatpush.xpose.msra.mxu0 %v525_v24  ;;  %1118 = vmatpush.xpose.msra.mxu2 %v525_v24 }
 0x113   : > { %629 = vmatpush.xpose.msra.mxu1 %v541_v25  ;;  %1134 = vmatpush.xpose.msra.mxu3 %v541_v25 }
 0x114   : > { %565 = vmatpush.xpose.msra.mxu0 %v524_v26  ;;  %1119 = vmatpush.xpose.msra.mxu2 %v524_v26 }
 0x117   : > { %630 = vmatpush.xpose.msra.mxu1 %v540_v27  ;;  %1135 = vmatpush.xpose.msra.mxu3 %v540_v27 }
 0x118   : > { %566 = vmatpush.xpose.msra.mxu0 %v523_v28  ;;  %1120 = vmatpush.xpose.msra.mxu2 %v523_v28 }
 0x11b   : > { %631 = vmatpush.xpose.msra.mxu1 %v539_v29  ;;  %1136 = vmatpush.xpose.msra.mxu3 %v539_v29 }
 0x11c   : > { %567 = vmatpush.xpose.msra.mxu0 %v522_v30  ;;  %1121 = vmatpush.xpose.msra.mxu2 %v522_v30 }
 0x11f   : > { %632 = vmatpush.xpose.msra.mxu1 %v538_v31  ;;  %1137 = vmatpush.xpose.msra.mxu3 %v538_v31 }
 0x120   : > { %568 = vmatpush.xpose.msra.mxu0 %v521_v32  ;;  %1122 = vmatpush.xpose.msra.mxu2 %v521_v32 }
 0x123   : > { %633 = vmatpush.xpose.msra.mxu1 %v537_v34  ;;  %1138 = vmatpush.xpose.msra.mxu3 %v537_v34 }
 0x124   : > { %569 = vmatmul.f32.vlgmr.msra.gmra.mxu0 %v505_v35  ;;  %593 = vmatmul.f32.vlgmr.msra.gmra.mxu2 %v513_v36 }
 0x126   : > { %634 = vmatmul.f32.vlgmr.msra.gmra.mxu1 %v505_v35  ;;  %658 = vmatmul.f32.vlgmr.msra.gmra.mxu3 %v513_v36 }
 0x12c   : > { %572 = vmatmul.f32.gmra.mxu0 %v506_v37  ;;  %596 = vmatmul.f32.gmra.mxu2 %v514_v38 }
 0x12e   : > { %637 = vmatmul.f32.gmra.mxu1 %v506_v37  ;;  %661 = vmatmul.f32.gmra.mxu3 %v514_v38 }
 0x134   : > { %575 = vmatmul.f32.gmra.mxu0 %v507_v39  ;;  %599 = vmatmul.f32.gmra.mxu2 %v515_v40 }
 0x136   : > { %640 = vmatmul.f32.gmra.mxu1 %v507_v39  ;;  %664 = vmatmul.f32.gmra.mxu3 %v515_v40 }
 0x13c   : > { %578 = vmatmul.f32.gmra.mxu0 %v508_v41  ;;  %602 = vmatmul.f32.gmra.mxu2 %v516_v42 }
 0x13e   : > { %643 = vmatmul.f32.gmra.mxu1 %v508_v41  ;;  %667 = vmatmul.f32.gmra.mxu3 %v516_v42 }
 0x144   : > { %581 = vmatmul.f32.gmra.mxu0 %v509_v43  ;;  %605 = vmatmul.f32.gmra.mxu2 %v517_v44 }
 0x146   : > { %646 = vmatmul.f32.gmra.mxu1 %v509_v43  ;;  %670 = vmatmul.f32.gmra.mxu3 %v517_v44 }
 0x14c   : > { %584 = vmatmul.f32.gmra.mxu0 %v510_v45  ;;  %608 = vmatmul.f32.gmra.mxu2 %v518_v46 }
 0x14e   : > { %649 = vmatmul.f32.gmra.mxu1 %v510_v45  ;;  %673 = vmatmul.f32.gmra.mxu3 %v518_v46 }
 0x154   : > { %587 = vmatmul.f32.gmra.mxu0 %v511_v47  ;;  %611 = vmatmul.f32.gmra.mxu2 %v519_v48 }
 0x156   : > { %652 = vmatmul.f32.gmra.mxu1 %v511_v47  ;;  %676 = vmatmul.f32.gmra.mxu3 %v519_v48 }
 0x15c   : > { %590 = vmatmul.f32.gmra.mxu0 %v512_v49  ;;  %614 = vmatmul.f32.gmra.mxu2 %v520_v50 }
 0x15e   : > { %655 = vmatmul.f32.gmra.mxu1 %v512_v49  ;;  %679 = vmatmul.f32.gmra.mxu3 %v520_v50 }
 0x1a1   : > { %v1634_v51 = vpop.f32.mrf.mxu0 }
 0x1a3   : > { %v1636_v52 = vpop.f32.mrf.mxu1 }
 0x1a4   : > { %v683_v53 = vmax.f32 %v1634_v51, %v1636_v52 }
 0x1a6   : > { %684 = vmax.xlane.f32.xlu0 %v683_v53 }
 0x1a7   : > { %v1640_v54 = vpop.f32.mrf.mxu2 }
 0x1a9   : > { %v1642_v55 = vpop.f32.mrf.mxu3  ;;  %v1644_v56 = vpop.f32.mrf.mxu0 }
 0x1aa   : > { %v707_v57 = vmax.f32 %v1640_v54, %v1642_v55 }
 0x1ab   : > { %v1648_v58 = vpop.f32.mrf.mxu1 }
 0x1ac   : > { %708 = vmax.xlane.f32.xlu2 %v707_v57  ;;  %v686_v59 = vmax.f32 %v1644_v56, %v1648_v58 }
 0x1ae   : > { %687 = vmax.xlane.f32.xlu0 %v686_v59 }
 0x1af   : > { %v1652_v60 = vpop.f32.mrf.mxu2 }
 0x1b1   : > { %v1654_v61 = vpop.f32.mrf.mxu3  ;;  %v1656_v62 = vpop.f32.mrf.mxu0 }
 0x1b2   : > { %v710_v63 = vmax.f32 %v1652_v60, %v1654_v61 }
 0x1b3   : > { %v1660_v0 = vpop.f32.mrf.mxu1 }
 0x1b4   : > { %v689_v1 = vmax.f32 %v1656_v62, %v1660_v0 }
 0x1b6   : > { %711 = vmax.xlane.f32.xlu0 %v710_v63  ;;  %690 = vmax.xlane.f32.xlu1 %v689_v1 }
 0x1b7   : > { %v1664_v2 = vpop.f32.mrf.mxu2 }
 0x1b9   : > { %v1666_v3 = vpop.f32.mrf.mxu3  ;;  %v1668_v4 = vpop.f32.mrf.mxu0 }
 0x1ba   : > { %v713_v5 = vmax.f32 %v1664_v2, %v1666_v3 }
 0x1bb   : > { %v1672_v6 = vpop.f32.mrf.mxu1 }
 0x1bc   : > { %v692_v11 = vmax.f32 %v1668_v4, %v1672_v6 }
 0x1be   : > { %714 = vmax.xlane.f32.xlu1 %v713_v5 }
 0x1bf   : > { %v1674_v7 = vpop.f32.mrf.mxu2 }
 0x1c1   : > { %v1676_v33 = vpop.f32.mrf.mxu3  ;;  %v1678_v8 = vpop.f32.mrf.mxu0 }
 0x1c2   : > { %v716_v9 = vmax.f32 %v1674_v7, %v1676_v33 }
 0x1c3   : > { %v1682_v10 = vpop.f32.mrf.mxu1 }
 0x1c4   : > { %717 = vmax.xlane.f32.xlu2 %v716_v9  ;;  %v695_v16 = vmax.f32 %v1678_v8, %v1682_v10 }
 0x1c6   : > { %693 = vmax.xlane.f32.xlu1 %v692_v11 }
 0x1c7   : > { %v1686_v12 = vpop.f32.mrf.mxu2 }
 0x1c9   : > { %v1688_v13 = vpop.f32.mrf.mxu3  ;;  %v1690_v14 = vpop.f32.mrf.mxu0 }
 0x1ca   : > { %v719_v15 = vmax.f32 %v1686_v12, %v1688_v13 }
 0x1cb   : > { %v1696_v17 = vpop.f32.mrf.mxu1 }
 0x1cc   : > { %720 = vmax.xlane.f32.xlu0 %v719_v15  ;;  %696 = vmax.xlane.f32.xlu2 %v695_v16  ;;  %v698_v21 = vmax.f32 %v1690_v14, %v1696_v17 }
 0x1cf   : > { %v1698_v18 = vpop.f32.mrf.mxu2 }
 0x1d1   : > { %v1700_v19 = vpop.f32.mrf.mxu3  ;;  %v1702_v20 = vpop.f32.mrf.mxu0 }
 0x1d2   : > { %v722_v34 = vmax.f32 %v1698_v18, %v1700_v19 }
 0x1d3   : > { %v1706_v22 = vpop.f32.mrf.mxu1 }
 0x1d4   : > { %699 = vmax.xlane.f32.xlu2 %v698_v21  ;;  %v701_v23 = vmax.f32 %v1702_v20, %v1706_v22 }
 0x1d6   : > { %702 = vmax.xlane.f32.xlu0 %v701_v23 }
 0x1d7   : > { %v1710_v24 = vpop.f32.mrf.mxu2 }
 0x1d9   : > { %v1712_v25 = vpop.f32.mrf.mxu3  ;;  %v1714_v26 = vpop.f32.mrf.mxu0 }
 0x1da   : > { %v725_v27 = vmax.f32 %v1710_v24, %v1712_v25 }
 0x1db   : > { %v1718_v28 = vpop.f32.mrf.mxu1 }
 0x1dc   : > { %v704_v29 = vmax.f32 %v1714_v26, %v1718_v28  ;;  %726 = vmax.xlane.f32.xlu2 %v725_v27 }
 0x1de   : > { %705 = vmax.xlane.f32.xlu1 %v704_v29 }
 0x1df   : > { %v1722_v30 = vpop.f32.mrf.mxu2 }
 0x1e1   : > { %v1724_v31 = vpop.f32.mrf.mxu3 }
 0x1e2   : > { %v728_v32 = vmax.f32 %v1722_v30, %v1724_v31 }
 0x1e4   : > { %729 = vmax.xlane.f32.xlu0 %v728_v32 }
 0x1e6   : > { %723 = vmax.xlane.f32.xlu1 %v722_v34 }
 0x219   : > { %v685_v35 = vpop.xlane.xlu0 %684 }
 0x21a   : > { %v731_v36 = vsub.f32 %v1634_v51, %v685_v35  ;;  %v732_v37 = vsub.f32 %v1636_v52, %v685_v35 }
 0x21c   : > { %v763_v38 = vmul.f32 1.442695, %v731_v36  ;;  %v765_v39 = vmul.f32 1.442695, %v732_v37 }
 0x21e   : > { %1213 = vpow2.f32 %v763_v38 }
 0x21f   : > { %1215 = vpow2.f32 %v765_v39  ;;  %v709_v40 = vpop.xlane.xlu2 %708 }
 0x220   : > { %v747_v41 = vsub.f32 %v1640_v54, %v709_v40  ;;  %v748_v42 = vsub.f32 %v1642_v55, %v709_v40 }
 0x221   : > { %v688_v43 = vpop.xlane.xlu0 %687 }
 0x222   : > { %v795_v44 = vmul.f32 1.442695, %v747_v41  ;;  %v797_v45 = vmul.f32 1.442695, %v748_v42  ;;  %v733_v46 = vsub.f32 %v1644_v56, %v688_v43  ;;  %v734_v47 = vsub.f32 %v1648_v58, %v688_v43 }
 0x224   : > { %v1736_v48 = vpop.eup %1213  ;;  %1217 = vpow2.f32 %v795_v44  ;;  %v767_v49 = vmul.f32 1.442695, %v733_v46  ;;  %v769_v50 = vmul.f32 1.442695, %v734_v47 }
 0x225   : > { %v1738_v51 = vpop.eup %1215  ;;  %1219 = vpow2.f32 %v797_v45 }
 0x226   : > { %1221 = vpow2.f32 %v767_v49  ;;  %v827_v52 = vadd.f32 %v1738_v51, %v1736_v48 }
 0x227   : > { %1223 = vpow2.f32 %v769_v50 }
 0x228   : > { %828 = vadd.xlane.f32.xlu1 %v827_v52 }
 0x229   : > { %v712_v53 = vpop.xlane.xlu0 %711  ;;  %v691_v54 = vpop.xlane.xlu1 %690 }
 0x22a   : > { %v1742_v55 = vpop.eup %1217  ;;  %v749_v56 = vsub.f32 %v1652_v60, %v712_v53  ;;  %v750_v57 = vsub.f32 %v1654_v61, %v712_v53  ;;  %v735_v58 = vsub.f32 %v1656_v62, %v691_v54  ;;  %v736_v59 = vsub.f32 %v1660_v0, %v691_v54 }
 0x22b   : > { %v1748_v63 = vpop.eup %1219 }
 0x22c   : > { %v1750_v1 = vpop.eup %1221  ;;  %v799_v5 = vmul.f32 1.442695, %v749_v56  ;;  %v801_v9 = vmul.f32 1.442695, %v750_v57  ;;  %v771_v11 = vmul.f32 1.442695, %v735_v58  ;;  %v851_v15 = vadd.f32 %v1748_v63, %v1742_v55 }
 0x22d   : > { %v1754_v16 = vpop.eup %1223  ;;  %v773_v21 = vmul.f32 1.442695, %v736_v59 }
 0x22e   : > { %1225 = vpow2.f32 %v799_v5  ;;  %852 = vadd.xlane.f32.xlu0 %v851_v15  ;;  %v830_v60 = vadd.f32 %v1754_v16, %v1750_v1 }
 0x22f   : > { %1227 = vpow2.f32 %v801_v9 }
 0x230   : > { %1229 = vpow2.f32 %v771_v11  ;;  %831 = vadd.xlane.f32.xlu2 %v830_v60 }
 0x231   : > { %1231 = vpow2.f32 %v773_v21  ;;  %v715_v61 = vpop.xlane.xlu1 %714 }
 0x232   : > { %v751_v62 = vsub.f32 %v1664_v2, %v715_v61  ;;  %v752_v0 = vsub.f32 %v1666_v3, %v715_v61 }
 0x234   : > { %v1760_v23 = vpop.eup %1225  ;;  %v803_v27 = vmul.f32 1.442695, %v751_v62  ;;  %v805_v29 = vmul.f32 1.442695, %v752_v0 }
 0x235   : > { %v1762_v32 = vpop.eup %1227 }
 0x236   : > { %v1764_v34 = vpop.eup %1229  ;;  %1233 = vpow2.f32 %v803_v27  ;;  %v854_v35 = vadd.f32 %v1762_v32, %v1760_v23 }
 0x237   : > { %v1768_v36 = vpop.eup %1231  ;;  %1235 = vpow2.f32 %v805_v29  ;;  %v718_v37 = vpop.xlane.xlu2 %717 }
 0x238   : > { %v753_v2 = vsub.f32 %v1674_v7, %v718_v37  ;;  %v754_v3 = vsub.f32 %v1676_v33, %v718_v37  ;;  %v833_v38 = vadd.f32 %v1768_v36, %v1764_v34  ;;  %855 = vadd.xlane.f32.xlu1 %v854_v35 }
 0x239   : > { %v694_v39 = vpop.xlane.xlu1 %693 }
 0x23a   : > { %v807_v40 = vmul.f32 1.442695, %v753_v2  ;;  %v809_v41 = vmul.f32 1.442695, %v754_v3  ;;  %834 = vadd.xlane.f32.xlu0 %v833_v38  ;;  %v737_v42 = vsub.f32 %v1668_v4, %v694_v39  ;;  %v738_v43 = vsub.f32 %v1672_v6, %v694_v39 }
 0x23c   : > { %v1776_v44 = vpop.eup %1233  ;;  %1237 = vpow2.f32 %v807_v40  ;;  %v775_v45 = vmul.f32 1.442695, %v737_v42  ;;  %v777_v46 = vmul.f32 1.442695, %v738_v43 }
 0x23d   : > { %v1778_v7 = vpop.eup %1235  ;;  %1239 = vpow2.f32 %v809_v41 }
 0x23e   : > { %1241 = vpow2.f32 %v775_v45  ;;  %v857_v33 = vadd.f32 %v1778_v7, %v1776_v44 }
 0x23f   : > { %1243 = vpow2.f32 %v777_v46  ;;  %v721_v47 = vpop.xlane.xlu0 %720  ;;  %v697_v49 = vpop.xlane.xlu2 %696 }
 0x240   : > { %v755_v50 = vsub.f32 %v1686_v12, %v721_v47  ;;  %v756_v4 = vsub.f32 %v1688_v13, %v721_v47  ;;  %v739_v6 = vsub.f32 %v1678_v8, %v697_v49  ;;  %v740_v52 = vsub.f32 %v1682_v10, %v697_v49  ;;  %858 = vadd.xlane.f32.xlu2 %v857_v33 }
 0x242   : > { %v1786_v53 = vpop.eup %1237  ;;  %v811_v54 = vmul.f32 1.442695, %v755_v50  ;;  %v813_v56 = vmul.f32 1.442695, %v756_v4  ;;  %v779_v57 = vmul.f32 1.442695, %v739_v6 }
 0x243   : > { %v1788_v58 = vpop.eup %1239  ;;  %v781_v59 = vmul.f32 1.442695, %v740_v52 }
 0x244   : > { %v1790_v5 = vpop.eup %1241  ;;  %1245 = vpow2.f32 %v811_v54  ;;  %v860_v12 = vadd.f32 %v1788_v58, %v1786_v53 }
 0x245   : > { %v1794_v13 = vpop.eup %1243  ;;  %1247 = vpow2.f32 %v813_v56 }
 0x246   : > { %1249 = vpow2.f32 %v779_v57  ;;  %861 = vadd.xlane.f32.xlu0 %v860_v12  ;;  %v836_v8 = vadd.f32 %v1794_v13, %v1790_v5 }
 0x247   : > { %1251 = vpow2.f32 %v781_v59  ;;  %v700_v10 = vpop.xlane.xlu2 %699 }
 0x248   : > { %v741_v9 = vsub.f32 %v1690_v14, %v700_v10  ;;  %v742_v11 = vsub.f32 %v1696_v17, %v700_v10  ;;  %837 = vadd.xlane.f32.xlu1 %v836_v8 }
 0x249   : > { %v703_v15 = vpop.xlane.xlu0 %702 }
 0x24a   : > { %v1800_v21 = vpop.eup %1245  ;;  %v783_v60 = vmul.f32 1.442695, %v741_v9  ;;  %v785_v61 = vmul.f32 1.442695, %v742_v11  ;;  %v743_v62 = vsub.f32 %v1702_v20, %v703_v15  ;;  %v744_v0 = vsub.f32 %v1706_v22, %v703_v15 }
 0x24b   : > { %v1804_v27 = vpop.eup %1247 }
 0x24c   : > { %v1806_v29 = vpop.eup %1249  ;;  %1253 = vpow2.f32 %v783_v60  ;;  %v787_v35 = vmul.f32 1.442695, %v743_v62  ;;  %v789_v37 = vmul.f32 1.442695, %v744_v0  ;;  %v863_v2 = vadd.f32 %v1804_v27, %v1800_v21 }
 0x24d   : > { %v1808_v14 = vpop.eup %1251  ;;  %1255 = vpow2.f32 %v785_v61 }
 0x24e   : > { %1257 = vpow2.f32 %v787_v35  ;;  %v839_v17 = vadd.f32 %v1808_v14, %v1806_v29 }
 0x24f   : > { %1259 = vpow2.f32 %v789_v37  ;;  %v727_v20 = vpop.xlane.xlu2 %726 }
 0x250   : > { %840 = vadd.xlane.f32.xlu2 %v839_v17  ;;  %v759_v22 = vsub.f32 %v1710_v24, %v727_v20  ;;  %v760_v3 = vsub.f32 %v1712_v25, %v727_v20  ;;  %864 = vadd.xlane.f32.xlu1 %v863_v2 }
 0x251   : > { %v706_v38 = vpop.xlane.xlu1 %705 }
 0x252   : > { %v1816_v39 = vpop.eup %1253  ;;  %v819_v40 = vmul.f32 1.442695, %v759_v22  ;;  %v821_v41 = vmul.f32 1.442695, %v760_v3  ;;  %v745_v42 = vsub.f32 %v1714_v26, %v706_v38  ;;  %v746_v43 = vsub.f32 %v1718_v28, %v706_v38 }
 0x253   : > { %v1820_v45 = vpop.eup %1255 }
 0x254   : > { %v1822_v46 = vpop.eup %1257  ;;  %1261 = vpow2.f32 %v819_v40  ;;  %v791_v33 = vmul.f32 1.442695, %v745_v42  ;;  %v793_v47 = vmul.f32 1.442695, %v746_v43  ;;  %v842_v24 = vadd.f32 %v1820_v45, %v1816_v39 }
 0x255   : > { %v1826_v25 = vpop.eup %1259  ;;  %1263 = vpow2.f32 %v821_v41 }
 0x256   : > { %1265 = vpow2.f32 %v791_v33  ;;  %843 = vadd.xlane.f32.xlu0 %v842_v24  ;;  %v845_v26 = vadd.f32 %v1826_v25, %v1822_v46 }
 0x257   : > { %1267 = vpow2.f32 %v793_v47  ;;  %v730_v28 = vpop.xlane.xlu0 %729 }
 0x258   : > { %v761_v49 = vsub.f32 %v1722_v30, %v730_v28  ;;  %v762_v50 = vsub.f32 %v1724_v31, %v730_v28  ;;  %846 = vadd.xlane.f32.xlu1 %v845_v26 }
 0x259   : > { %v724_v4 = vpop.xlane.xlu1 %723 }
 0x25a   : > { %v1832_v6 = vpop.eup %1261  ;;  %v823_v52 = vmul.f32 1.442695, %v761_v49  ;;  %v825_v54 = vmul.f32 1.442695, %v762_v50  ;;  %v757_v56 = vsub.f32 %v1698_v18, %v724_v4  ;;  %v758_v57 = vsub.f32 %v1700_v19, %v724_v4 }
 0x25b   : > { %v1836_v59 = vpop.eup %1263 }
 0x25c   : > { %v1838_v12 = vpop.eup %1265  ;;  %1269 = vpow2.f32 %v823_v52  ;;  %v815_v8 = vmul.f32 1.442695, %v757_v56  ;;  %v817_v10 = vmul.f32 1.442695, %v758_v57  ;;  %v869_v30 = vadd.f32 %v1836_v59, %v1832_v6 }
 0x25d   : > { %v1842_v31 = vpop.eup %1267  ;;  %1271 = vpow2.f32 %v825_v54 }
 0x25e   : > { %1273 = vpow2.f32 %v815_v8  ;;  %870 = vadd.xlane.f32.xlu0 %v869_v30  ;;  %v848_v18 = vadd.f32 %v1842_v31, %v1838_v12 }
 0x25f   : > { %1275 = vpow2.f32 %v817_v10 }
 0x260   : > { %849 = vadd.xlane.f32.xlu2 %v848_v18 }
 0x262   : > { %v1846_v19 = vpop.eup %1269 }
 0x263   : > { %v1848_v9 = vpop.eup %1271 }
 0x264   : > { %v1850_v11 = vpop.eup %1273  ;;  %v872_v15 = vadd.f32 %v1848_v9, %v1846_v19 }
 0x265   : > { %v1854_v60 = vpop.eup %1275 }
 0x266   : > { %873 = vadd.xlane.f32.xlu1 %v872_v15  ;;  %v866_v61 = vadd.f32 %v1854_v60, %v1850_v11 }
 0x268   : > { %867 = vadd.xlane.f32.xlu2 %v866_v61 }
 0x29b   : > { %v829_v62 = vpop.xlane.xlu1 %828 }
 0x29c   : > { %1277 = vrcp.f32 %v829_v62 }
 0x2a1   : > { %v853_v0 = vpop.xlane.xlu0 %852 }
 0x2a2   : > { %v1278_v35 = vpop.eup %1277  ;;  %1279 = vrcp.f32 %v853_v0 }
 0x2a3   : > { %v891_v37 = vmul.f32 %v1278_v35, %v1736_v48  ;;  %v892_v17 = vmul.f32 %v1278_v35, %v1738_v51  ;;  %v832_v2 = vpop.xlane.xlu2 %831 }
 0x2a4   : > { %1281 = vrcp.f32 %v832_v2 }
 0x2a5   : > { %923 = vst [vmem:[%s1508_s11] sm:$0xff] %v891_v37 }
 0x2a6   : > { %924 = vst [vmem:[%s1508_s11 + $0x8] sm:$0xff] %v892_v17 }
 0x2a8   : > { %v1280_v20 = vpop.eup %1279 }
 0x2a9   : > { %v907_v22 = vmul.f32 %v1280_v20, %v1742_v55  ;;  %v908_v3 = vmul.f32 %v1280_v20, %v1748_v63 }
 0x2aa   : > { %v1282_v38 = vpop.eup %1281 }
 0x2ab   : > { %939 = vst [vmem:[%s1508_s11 + $0x80] sm:$0xff] %v907_v22  ;;  %v893_v40 = vmul.f32 %v1282_v38, %v1750_v1  ;;  %v894_v41 = vmul.f32 %v1282_v38, %v1754_v16  ;;  %v856_v48 = vpop.xlane.xlu1 %855 }
 0x2ac   : > { %940 = vst [vmem:[%s1508_s11 + $0x88] sm:$0xff] %v908_v3  ;;  %1283 = vrcp.f32 %v856_v48 }
 0x2ad   : > { %925 = vst [vmem:[%s1508_s11 + $0x10] sm:$0xff] %v893_v40  ;;  %v835_v51 = vpop.xlane.xlu0 %834 }
 0x2ae   : > { %926 = vst [vmem:[%s1508_s11 + $0x18] sm:$0xff] %v894_v41  ;;  %1285 = vrcp.f32 %v835_v51 }
 0x2b2   : > { %v1284_v55 = vpop.eup %1283 }
 0x2b3   : > { %v909_v63 = vmul.f32 %v1284_v55, %v1760_v23  ;;  %v910_v42 = vmul.f32 %v1284_v55, %v1762_v32  ;;  %v859_v43 = vpop.xlane.xlu2 %858 }
 0x2b4   : > { %v1286_v1 = vpop.eup %1285  ;;  %1287 = vrcp.f32 %v859_v43 }
 0x2b5   : > { %v895_v16 = vmul.f32 %v1286_v1, %v1764_v34  ;;  %v896_v33 = vmul.f32 %v1286_v1, %v1768_v36  ;;  %941 = vst [vmem:[%s1508_s11 + $0x90] sm:$0xff] %v909_v63 }
 0x2b6   : > { %942 = vst [vmem:[%s1508_s11 + $0x98] sm:$0xff] %v910_v42 }
 0x2b7   : > { %927 = vst [vmem:[%s1508_s11 + $0x20] sm:$0xff] %v895_v16 }
 0x2b8   : > { %928 = vst [vmem:[%s1508_s11 + $0x28] sm:$0xff] %v896_v33 }
 0x2b9   : > { %v862_v47 = vpop.xlane.xlu0 %861 }
 0x2ba   : > { %v1288_v24 = vpop.eup %1287  ;;  %1289 = vrcp.f32 %v862_v47 }
 0x2bb   : > { %v911_v23 = vmul.f32 %v1288_v24, %v1776_v44  ;;  %v912_v32 = vmul.f32 %v1288_v24, %v1778_v7  ;;  %v838_v26 = vpop.xlane.xlu1 %837 }
 0x2bc   : > { %1291 = vrcp.f32 %v838_v26 }
 0x2bd   : > { %943 = vst [vmem:[%s1508_s11 + $0xa0] sm:$0xff] %v911_v23 }
 0x2be   : > { %944 = vst [vmem:[%s1508_s11 + $0xa8] sm:$0xff] %v912_v32 }
 0x2c0   : > { %v1290_v34 = vpop.eup %1289 }
 0x2c1   : > { %v913_v36 = vmul.f32 %v1290_v34, %v1786_v53  ;;  %v914_v28 = vmul.f32 %v1290_v34, %v1788_v58 }
 0x2c2   : > { %v1292_v49 = vpop.eup %1291 }
 0x2c3   : > { %945 = vst [vmem:[%s1508_s11 + $0xb0] sm:$0xff] %v913_v36  ;;  %v897_v50 = vmul.f32 %v1292_v49, %v1790_v5  ;;  %v898_v4 = vmul.f32 %v1292_v49, %v1794_v13  ;;  %v841_v44 = vpop.xlane.xlu2 %840  ;;  %v865_v52 = vpop.xlane.xlu1 %864 }
 0x2c4   : > { %946 = vst [vmem:[%s1508_s11 + $0xb8] sm:$0xff] %v914_v28  ;;  %1293 = vrcp.f32 %v841_v44 }
 0x2c5   : > { %929 = vst [vmem:[%s1508_s11 + $0x30] sm:$0xff] %v897_v50  ;;  %1295 = vrcp.f32 %v865_v52 }
 0x2c6   : > { %930 = vst [vmem:[%s1508_s11 + $0x38] sm:$0xff] %v898_v4 }
 0x2c9   : > { %v844_v7 = vpop.xlane.xlu0 %843 }
 0x2ca   : > { %v1294_v53 = vpop.eup %1293  ;;  %1297 = vrcp.f32 %v844_v7 }
 0x2cb   : > { %v1296_v58 = vpop.eup %1295  ;;  %v899_v54 = vmul.f32 %v1294_v53, %v1806_v29  ;;  %v900_v5 = vmul.f32 %v1294_v53, %v1808_v14  ;;  %v847_v13 = vpop.xlane.xlu1 %846 }
 0x2cc   : > { %v915_v56 = vmul.f32 %v1296_v58, %v1800_v21  ;;  %v916_v57 = vmul.f32 %v1296_v58, %v1804_v27  ;;  %1299 = vrcp.f32 %v847_v13 }
 0x2cd   : > { %931 = vst [vmem:[%s1508_s11 + $0x40] sm:$0xff] %v899_v54 }
 0x2ce   : > { %932 = vst [vmem:[%s1508_s11 + $0x48] sm:$0xff] %v900_v5 }
 0x2cf   : > { %947 = vst [vmem:[%s1508_s11 + $0xc0] sm:$0xff] %v915_v56 }
 0x2d0   : > { %v1298_v8 = vpop.eup %1297  ;;  %948 = vst [vmem:[%s1508_s11 + $0xc8] sm:$0xff] %v916_v57 }
 0x2d1   : > { %v901_v29 = vmul.f32 %v1298_v8, %v1816_v39  ;;  %v902_v14 = vmul.f32 %v1298_v8, %v1820_v45  ;;  %v871_v10 = vpop.xlane.xlu0 %870 }
 0x2d2   : > { %v1300_v30 = vpop.eup %1299  ;;  %1301 = vrcp.f32 %v871_v10 }
 0x2d3   : > { %933 = vst [vmem:[%s1508_s11 + $0x50] sm:$0xff] %v901_v29  ;;  %v903_v21 = vmul.f32 %v1300_v30, %v1822_v46  ;;  %v904_v27 = vmul.f32 %v1300_v30, %v1826_v25  ;;  %v850_v18 = vpop.xlane.xlu2 %849 }
 0x2d4   : > { %934 = vst [vmem:[%s1508_s11 + $0x58] sm:$0xff] %v902_v14  ;;  %1303 = vrcp.f32 %v850_v18 }
 0x2d5   : > { %935 = vst [vmem:[%s1508_s11 + $0x60] sm:$0xff] %v903_v21 }
 0x2d6   : > { %936 = vst [vmem:[%s1508_s11 + $0x68] sm:$0xff] %v904_v27 }
 0x2d8   : > { %v1302_v39 = vpop.eup %1301 }
 0x2d9   : > { %v919_v45 = vmul.f32 %v1302_v39, %v1832_v6  ;;  %v920_v46 = vmul.f32 %v1302_v39, %v1836_v59  ;;  %v874_v15 = vpop.xlane.xlu1 %873 }
 0x2da   : > { %v1304_v25 = vpop.eup %1303  ;;  %1305 = vrcp.f32 %v874_v15 }
 0x2db   : > { %951 = vst [vmem:[%s1508_s11 + $0xe0] sm:$0xff] %v919_v45  ;;  %v905_v61 = vmul.f32 %v1304_v25, %v1838_v12  ;;  %v906_v62 = vmul.f32 %v1304_v25, %v1842_v31  ;;  %v868_v0 = vpop.xlane.xlu2 %867 }
 0x2dc   : > { %952 = vst [vmem:[%s1508_s11 + $0xe8] sm:$0xff] %v920_v46  ;;  %1307 = vrcp.f32 %v868_v0 }
 0x2dd   : > { %937 = vst [vmem:[%s1508_s11 + $0x70] sm:$0xff] %v905_v61 }
 0x2de   : > { %938 = vst [vmem:[%s1508_s11 + $0x78] sm:$0xff] %v906_v62 }
 0x2e0   : > { %v1306_v6 = vpop.eup %1305 }
 0x2e1   : > { %v921_v59 = vmul.f32 %v1306_v6, %v1846_v19  ;;  %v922_v12 = vmul.f32 %v1306_v6, %v1848_v9 }
 0x2e2   : > { %v1308_v31 = vpop.eup %1307 }
 0x2e3   : > { %953 = vst [vmem:[%s1508_s11 + $0xf0] sm:$0xff] %v921_v59  ;;  %v917_v35 = vmul.f32 %v1308_v31, %v1850_v11  ;;  %v918_v37 = vmul.f32 %v1308_v31, %v1854_v60 }
 0x2e4   : > { %954 = vst [vmem:[%s1508_s11 + $0xf8] sm:$0xff] %v922_v12 }
 0x2e5   : > { %949 = vst [vmem:[%s1508_s11 + $0xd0] sm:$0xff] %v917_v35 }
 0x2e6   : > { %950 = vst [vmem:[%s1508_s11 + $0xd8] sm:$0xff] %v918_v37 }
 0x2e7   : > { %1336 = shalt.err (!%p1333_p7)
}
 0x2e8   : > { %s1405_s4 = smov 256   ;;  %s1406_s11 = smov 16  }
 0x2e9   : > { %1139 = dma.vmem_to_hbm [thread:$0]  (%p1478_p3), %s972_s10, 4096, %s974_s20, %s956_s21, %s1405_s4, %s1405_s4, %s1406_s11  }
 0x2ea PF: > { %p1145_p9 = scmp.ge.s32.totalorder %s1403_s19, 2  ;;  %s988_s8 = sand.u32 1, %s1375_s12  }
 0x2eb   : > { %s989_s15 = scalar_lea.sflag [#allocation4], %s988_s8 }
 0x2ec   : > { %p1142_p10 = pnand %p1145_p9, %p1487_p8 }
 0x2ee   : > { %p1143_p11 = pneg %p1142_p10 }
 0x2f0   : > { %1370 = dma.done.wait (%p1143_p11), %s989_s15, 4096  }
 0x2f1   : > { %1372 = vsyncadd (%p1143_p11), %s989_s15, 4294963200  ;;  %s16_s19 = sadd.s32 1, %s1403_s19   ;;  %s1974_s12 = smov %s1379_s13 }
 0x2f2   : > { %p13_p12 = scmp.ge.s32.totalorder %s16_s19, 6   ;;  %s1975_s13 = smov %s1383_s14 }
 0x2f3   : > { %s1976_s14 = smov %s1496_s30  ;;  %s1977_s15 = smov %s1395_s17 }
 0x2f4   : > { %s1978_s16 = smov %s1399_s18  ;;  %s1979_s17 = smov %s1982_s22 }
 0x2f5   : > { %s1980_s18 = smov %s1986_s23  ;;  %15 = sbr.rel (!%p13_p12) target bundleno = 5 (0x5), region = 72 }
 0x2fa   :  { %995 = vsyncpa [#allocation4], 1 }
 0x2fb   :  { %997 = vsyncpa [#allocation4 + $0x1], 1 }

</bundles_post_ra>
